<compile_context>
chip_gen: v5e
topology: v5e:2x2
jax: 0.10.0
libtpu: 0.0.40
codegen_flags: <defaults>
</compile_context>

<pallas_src>
import jax
import jax.numpy as jnp
from jax import lax
from jax.experimental import pallas as pl
from jax.experimental.pallas import tpu as pltpu

LEAKY_SLOPE = 0.01   # nn.LeakyReLU() default
IN_EPS = 1e-5        # nn.InstanceNorm2d default eps (affine=False)


def _make_fused_kernel(IC, OC1, CR, OC2, OH, OW):
    """Fused conv1(3x3,s2,p1)+IN+LReLU -> concat -> conv2(3x3,s1,p1)+IN+LReLU."""
    CIN = OC1 + CR
    WP2 = OW + 2                  # padded row pitch shared by both convs / concat
    LOUT = OH * WP2               # flat length of one conv output (2 wrap cols/row)
    LCAT = (OH + 2) * WP2 + 8     # flat padded-concat length (+8 slack for tap overrun)
    CNT = float(OH * OW)          # number of valid spatial positions per channel

    def in_lrelu(acc, mask):
        # One-pass InstanceNorm stats over the masked valid columns + LeakyReLU.
        # All epilogue math stays in f32 (v5e has no bf16 VPU/EUP datapath).
        s1 = jnp.sum(acc * mask, axis=1, keepdims=True)
        s2 = jnp.sum(acc * acc * mask, axis=1, keepdims=True)
        mean = s1 * (1.0 / CNT)
        var = jnp.maximum(s2 * (1.0 / CNT) - mean * mean, 0.0)   # clamp one-pass var
        xn = (acc - mean) * lax.rsqrt(var + IN_EPS)
        return jnp.where(xn >= 0, xn, LEAKY_SLOPE * xn)

    def kernel(xph_ref, rem_ref, mask_ref, w1_ref, w2_ref, o_ref,
               slab1, catp, slab2):
        mask = mask_ref[...]                                      # (1, LOUT) f32

        # ---- conv1: 3x3 / stride 2 / pad 1 as ONE K=9*IC MXU contraction ----
        # Each tap is a contiguous flat-lane slice of the stride-2 phase planes
        # (row pitch WP2): no window repack, no reshape.
        for kh in range(3):
            for kw in range(3):
                t = kh * 3 + kw
                p = (kh % 2) * 2 + (kw % 2)
                off = (kh // 2) * WP2 + (kw // 2)
                slab1[t * IC:(t + 1) * IC, :] = (
                    xph_ref[0, p * IC:(p + 1) * IC, off:off + LOUT])
        acc1 = jnp.dot(w1_ref[...], slab1[...],
                       preferred_element_type=jnp.float32)        # (OC1, LOUT) f32
        y1 = in_lrelu(acc1, mask) * mask          # zero wrap cols -> they become pad

        # ---- zero-padded virtual concat [x1 | rem], built entirely in VMEM ----
        # x1 never touches HBM; the wrap columns of y1/rem land exactly on the
        # left/right pad columns, so a single contiguous store fills interior+pads.
        catp[:, 0:WP2 + 1] = jnp.zeros((CIN, WP2 + 1), jnp.bfloat16)
        catp[:, (OH + 1) * WP2 + 1:LCAT] = jnp.zeros(
            (CIN, LCAT - (OH + 1) * WP2 - 1), jnp.bfloat16)
        catp[0:OC1, WP2 + 1:WP2 + 1 + LOUT] = y1.astype(jnp.bfloat16)
        catp[OC1:CIN, WP2 + 1:WP2 + 1 + LOUT] = rem_ref[0]

        # ---- conv2: 3x3 / stride 1 / pad 1 as ONE K=9*(OC1+CR) contraction ----
        for kh in range(3):
            for kw in range(3):
                t = kh * 3 + kw
                off = kh * WP2 + kw
                slab2[t * CIN:(t + 1) * CIN, :] = catp[:, off:off + LOUT]
        acc2 = jnp.dot(w2_ref[...], slab2[...],
                       preferred_element_type=jnp.float32)        # (OC2, LOUT) f32
        # Lane-dense, channel-major store; wrap columns are sliced off in XLA.
        o_ref[0] = in_lrelu(acc2, mask).astype(o_ref.dtype)

    return kernel


def conv2x_in_forward(x_nchw, rem_nchw, w1_oihw, w2_oihw):
    """Conv2x_IN.forward (deconv=False, is_3d=False, concat=True, keep_concat=True)."""
    N, IC, H, W = x_nchw.shape
    Nr, CR, Hr, Wr = rem_nchw.shape
    OC1 = w1_oihw.shape[0]
    OC2, CIN = w2_oihw.shape[0], w2_oihw.shape[1]
    assert Nr == N and w1_oihw.shape == (OC1, IC, 3, 3)
    assert w2_oihw.shape == (OC2, CIN, 3, 3) and CIN == OC1 + CR
    assert H % 2 == 0 and W % 2 == 0, "stride-2 phase split expects even H, W"
    OH, OW = H // 2, W // 2
    # Standard Conv2x_IN usage: conv1's stride-2 output already matches rem, so
    # F.interpolate(..., mode='nearest') is the identity.
    # TODO(synk): general nearest-resize path for mismatched x / rem resolutions.
    assert (OH, OW) == (Hr, Wr), "unsupported: conv1 output size != rem size"

    WP2 = OW + 2
    LOUT = OH * WP2

    # bf16 MXU operands, f32 accumulation in-kernel (~1e-2 rel. tolerance vs f32).
    xb = x_nchw.astype(jnp.bfloat16)
    remb = rem_nchw.astype(jnp.bfloat16)

    # Stride-2 phase planes of the zero-padded input, stacked into ONE array
    # (one DMA per grid step) with row pitch WP2 and flattened, so every conv1
    # tap is a contiguous lane slice inside the kernel.
    xp = jnp.pad(xb, ((0, 0), (0, 0), (1, 1), (1, 1)))
    phases = jnp.stack([xp[:, :, a::2, b::2] for a in (0, 1) for b in (0, 1)],
                       axis=1)                                    # (N,4,IC,OH+1,OW+1)
    phases = jnp.pad(phases, ((0, 0), (0, 0), (0, 0), (0, 1), (0, 1)))
    xphf = phases.reshape(N, 4 * IC, (OH + 2) * (OW + 2))

    # rem padded to the same WP2 row pitch (2 zero columns) and flattened.
    remf = jnp.pad(remb, ((0, 0), (0, 0), (0, 0), (0, 2))).reshape(N, CR, LOUT)

    # Valid-column mask (wrap columns excluded from IN stats / catp stores).
    mask = jnp.pad(jnp.ones((OH, OW), jnp.float32),
                   ((0, 0), (0, 2))).reshape(1, LOUT)

    # All 9 taps folded into the contraction dim -> one large-K matmul per conv.
    w1f = jnp.transpose(w1_oihw, (0, 2, 3, 1)).reshape(OC1, 9 * IC).astype(jnp.bfloat16)
    w2f = jnp.transpose(w2_oihw, (0, 2, 3, 1)).reshape(OC2, 9 * CIN).astype(jnp.bfloat16)

    out = pl.pallas_call(
        _make_fused_kernel(IC, OC1, CR, OC2, OH, OW),
        out_shape=jax.ShapeDtypeStruct((N, OC2, LOUT), x_nchw.dtype),
        grid=(N,),
        in_specs=[
            pl.BlockSpec((1, 4 * IC, (OH + 2) * (OW + 2)), lambda n: (n, 0, 0)),
            pl.BlockSpec((1, CR, LOUT), lambda n: (n, 0, 0)),
            pl.BlockSpec((1, LOUT), lambda n: (0, 0)),
            pl.BlockSpec((OC1, 9 * IC), lambda n: (0, 0)),
            pl.BlockSpec((OC2, 9 * CIN), lambda n: (0, 0)),
        ],
        out_specs=pl.BlockSpec((1, OC2, LOUT), lambda n: (n, 0, 0)),
        scratch_shapes=[
            pltpu.VMEM((9 * IC, LOUT), jnp.bfloat16),             # conv1 tap slab
            pltpu.VMEM((CIN, (OH + 2) * WP2 + 8), jnp.bfloat16),  # padded concat
            pltpu.VMEM((9 * CIN, LOUT), jnp.bfloat16),            # conv2 tap slab
        ],
        compiler_params=pltpu.CompilerParams(
            dimension_semantics=("parallel",),
            vmem_limit_bytes=64 * 1024 * 1024),
    )(xphf, remf, mask, w1f, w2f)

    # Drop the 2 wrap columns per row; the leading reshape is a free row-major split.
    return out.reshape(N, OC2, OH, WP2)[:, :, :, :OW]


if __name__ == "__main__":
    key = jax.random.PRNGKey(0)
    k1, k2, k3, k4 = jax.random.split(key, 4)

    in_channels, out_channels = 4, 8
    N = 2
    # x at full resolution, rem one downsample below (standard Conv2x_IN usage)
    x = jax.random.normal(k1, (N, in_channels, 16, 16), dtype=jnp.float32)
    rem = jax.random.normal(k2, (N, out_channels, 8, 8), dtype=jnp.float32)

    # bias=False convs:
    #   conv1: (out_channels, in_channels, 3, 3), stride 2
    #   conv2: (2*out_channels, 2*out_channels, 3, 3), stride 1 (concat+keep_concat)
    w1 = 0.1 * jax.random.normal(k3, (out_channels, in_channels, 3, 3),
                                 dtype=jnp.float32)
    w2 = 0.1 * jax.random.normal(k4, (2 * out_channels, 2 * out_channels, 3, 3),
                                 dtype=jnp.float32)

    out = jax.jit(conv2x_in_forward)(x, rem, w1, w2)
    jax.block_until_ready(out)
    assert out.shape == (N, 2 * out_channels, 8, 8), out.shape
    assert bool(jnp.isfinite(out).all())
    print("KERNEL_OK")
</pallas_src>

<mosaic_0001>
module attributes {stable_mosaic.version = 11 : i64} {
  func.func @kernel(%arg0: i32, %arg1: memref<1x16x100xbf16, #tpu.memory_space<vmem>>, %arg2: memref<1x8x80xbf16, #tpu.memory_space<vmem>>, %arg3: memref<1x80xf32, #tpu.memory_space<vmem>>, %arg4: memref<8x36xbf16, #tpu.memory_space<vmem>>, %arg5: memref<16x144xbf16, #tpu.memory_space<vmem>>, %arg6: memref<1x16x80xf32, #tpu.memory_space<vmem>>, %arg7: memref<36x80xbf16, #tpu.memory_space<vmem>>, %arg8: memref<16x108xbf16, #tpu.memory_space<vmem>>, %arg9: memref<144x80xbf16, #tpu.memory_space<vmem>>) attributes {dimension_semantics = [#tpu.dimension_semantics<parallel>], iteration_bounds = array<i64: 2>, scalar_prefetch = 0 : i64, scratch_operands = 3 : i64, tpu.core_type = #tpu.core_type<tc>, window_params = [{transform_indices = @transform_0, window_bounds = array<i64: 1, 16, 100>}, {transform_indices = @transform_1, window_bounds = array<i64: 1, 8, 80>}, {pipeline_mode = #tpu.pipeline_mode<synchronous>, transform_indices = @transform_2, window_bounds = array<i64: 1, 80>}, {pipeline_mode = #tpu.pipeline_mode<synchronous>, transform_indices = @transform_3, window_bounds = array<i64: 8, 36>}, {pipeline_mode = #tpu.pipeline_mode<synchronous>, transform_indices = @transform_4, window_bounds = array<i64: 16, 144>}, {transform_indices = @transform_5, window_bounds = array<i64: 1, 16, 80>}]} {
    %c0 = arith.constant 0 : index
    %c0_0 = arith.constant 0 : index
    %0 = vector.load %arg3[%c0, %c0_0] : memref<1x80xf32, #tpu.memory_space<vmem>>, vector<1x80xf32>
    %c0_1 = arith.constant 0 : index
    %c0_2 = arith.constant 0 : index
    %c0_3 = arith.constant 0 : index
    %1 = vector.load %arg1[%c0_1, %c0_2, %c0_3] : memref<1x16x100xbf16, #tpu.memory_space<vmem>>, vector<1x4x80xbf16>
    %2 = vector.shape_cast %1 : vector<1x4x80xbf16> to vector<4x80xbf16>
    %c0_4 = arith.constant 0 : index
    %c0_5 = arith.constant 0 : index
    %3 = vector.load %arg7[%c0_4, %c0_5] : memref<36x80xbf16, #tpu.memory_space<vmem>>, vector<4x80xbf16>
    tpu.vector_store %arg7[%c0_4, %c0_5], %2 {strides = array<i32>} : memref<36x80xbf16, #tpu.memory_space<vmem>>, vector<4x80xbf16>,
    %c0_6 = arith.constant 0 : index
    %c4 = arith.constant 4 : index
    %c0_7 = arith.constant 0 : index
    %4 = vector.load %arg1[%c0_6, %c4, %c0_7] : memref<1x16x100xbf16, #tpu.memory_space<vmem>>, vector<1x4x80xbf16>
    %5 = vector.shape_cast %4 : vector<1x4x80xbf16> to vector<4x80xbf16>
    %c4_8 = arith.constant 4 : index
    %c0_9 = arith.constant 0 : index
    %6 = vector.load %arg7[%c4_8, %c0_9] : memref<36x80xbf16, #tpu.memory_space<vmem>>, vector<4x80xbf16>
    tpu.vector_store %arg7[%c4_8, %c0_9], %5 {strides = array<i32>} : memref<36x80xbf16, #tpu.memory_space<vmem>>, vector<4x80xbf16>,
    %c0_10 = arith.constant 0 : index
    %c0_11 = arith.constant 0 : index
    %c1 = arith.constant 1 : index
    %7 = vector.load %arg1[%c0_10, %c0_11, %c1] : memref<1x16x100xbf16, #tpu.memory_space<vmem>>, vector<1x4x80xbf16>
    %8 = vector.shape_cast %7 : vector<1x4x80xbf16> to vector<4x80xbf16>
    %c8 = arith.constant 8 : index
    %c0_12 = arith.constant 0 : index
    %9 = vector.load %arg7[%c8, %c0_12] : memref<36x80xbf16, #tpu.memory_space<vmem>>, vector<4x80xbf16>
    tpu.vector_store %arg7[%c8, %c0_12], %8 {strides = array<i32>} : memref<36x80xbf16, #tpu.memory_space<vmem>>, vector<4x80xbf16>,
    %c0_13 = arith.constant 0 : index
    %c8_14 = arith.constant 8 : index
    %c0_15 = arith.constant 0 : index
    %10 = vector.load %arg1[%c0_13, %c8_14, %c0_15] : memref<1x16x100xbf16, #tpu.memory_space<vmem>>, vector<1x4x80xbf16>
    %11 = vector.shape_cast %10 : vector<1x4x80xbf16> to vector<4x80xbf16>
    %c12 = arith.constant 12 : index
    %c0_16 = arith.constant 0 : index
    %12 = vector.load %arg7[%c12, %c0_16] : memref<36x80xbf16, #tpu.memory_space<vmem>>, vector<4x80xbf16>
    tpu.vector_store %arg7[%c12, %c0_16], %11 {strides = array<i32>} : memref<36x80xbf16, #tpu.memory_space<vmem>>, vector<4x80xbf16>,
    %c0_17 = arith.constant 0 : index
    %c12_18 = arith.constant 12 : index
    %c0_19 = arith.constant 0 : index
    %13 = vector.load %arg1[%c0_17, %c12_18, %c0_19] : memref<1x16x100xbf16, #tpu.memory_space<vmem>>, vector<1x4x80xbf16>
    %14 = vector.shape_cast %13 : vector<1x4x80xbf16> to vector<4x80xbf16>
    %c16 = arith.constant 16 : index
    %c0_20 = arith.constant 0 : index
    %15 = vector.load %arg7[%c16, %c0_20] : memref<36x80xbf16, #tpu.memory_space<vmem>>, vector<4x80xbf16>
    tpu.vector_store %arg7[%c16, %c0_20], %14 {strides = array<i32>} : memref<36x80xbf16, #tpu.memory_space<vmem>>, vector<4x80xbf16>,
    %c0_21 = arith.constant 0 : index
    %c8_22 = arith.constant 8 : index
    %c1_23 = arith.constant 1 : index
    %16 = vector.load %arg1[%c0_21, %c8_22, %c1_23] : memref<1x16x100xbf16, #tpu.memory_space<vmem>>, vector<1x4x80xbf16>
    %17 = vector.shape_cast %16 : vector<1x4x80xbf16> to vector<4x80xbf16>
    %c20 = arith.constant 20 : index
    %c0_24 = arith.constant 0 : index
    %18 = vector.load %arg7[%c20, %c0_24] : memref<36x80xbf16, #tpu.memory_space<vmem>>, vector<4x80xbf16>
    tpu.vector_store %arg7[%c20, %c0_24], %17 {strides = array<i32>} : memref<36x80xbf16, #tpu.memory_space<vmem>>, vector<4x80xbf16>,
    %c0_25 = arith.constant 0 : index
    %c0_26 = arith.constant 0 : index
    %c10 = arith.constant 10 : index
    %19 = vector.load %arg1[%c0_25, %c0_26, %c10] : memref<1x16x100xbf16, #tpu.memory_space<vmem>>, vector<1x4x80xbf16>
    %20 = vector.shape_cast %19 : vector<1x4x80xbf16> to vector<4x80xbf16>
    %c24 = arith.constant 24 : index
    %c0_27 = arith.constant 0 : index
    %21 = vector.load %arg7[%c24, %c0_27] : memref<36x80xbf16, #tpu.memory_space<vmem>>, vector<4x80xbf16>
    tpu.vector_store %arg7[%c24, %c0_27], %20 {strides = array<i32>} : memref<36x80xbf16, #tpu.memory_space<vmem>>, vector<4x80xbf16>,
    %c0_28 = arith.constant 0 : index
    %c4_29 = arith.constant 4 : index
    %c10_30 = arith.constant 10 : index
    %22 = vector.load %arg1[%c0_28, %c4_29, %c10_30] : memref<1x16x100xbf16, #tpu.memory_space<vmem>>, vector<1x4x80xbf16>
    %23 = vector.shape_cast %22 : vector<1x4x80xbf16> to vector<4x80xbf16>
    %c28 = arith.constant 28 : index
    %c0_31 = arith.constant 0 : index
    %24 = vector.load %arg7[%c28, %c0_31] : memref<36x80xbf16, #tpu.memory_space<vmem>>, vector<4x80xbf16>
    tpu.vector_store %arg7[%c28, %c0_31], %23 {strides = array<i32>} : memref<36x80xbf16, #tpu.memory_space<vmem>>, vector<4x80xbf16>,
    %c0_32 = arith.constant 0 : index
    %c0_33 = arith.constant 0 : index
    %c11 = arith.constant 11 : index
    %25 = vector.load %arg1[%c0_32, %c0_33, %c11] : memref<1x16x100xbf16, #tpu.memory_space<vmem>>, vector<1x4x80xbf16>
    %26 = vector.shape_cast %25 : vector<1x4x80xbf16> to vector<4x80xbf16>
    %c32 = arith.constant 32 : index
    %c0_34 = arith.constant 0 : index
    %27 = vector.load %arg7[%c32, %c0_34] : memref<36x80xbf16, #tpu.memory_space<vmem>>, vector<4x80xbf16>
    tpu.vector_store %arg7[%c32, %c0_34], %26 {strides = array<i32>} : memref<36x80xbf16, #tpu.memory_space<vmem>>, vector<4x80xbf16>,
    %c0_35 = arith.constant 0 : index
    %c0_36 = arith.constant 0 : index
    %28 = vector.load %arg4[%c0_35, %c0_36] : memref<8x36xbf16, #tpu.memory_space<vmem>>, vector<8x36xbf16>
    %c0_37 = arith.constant 0 : index
    %c0_38 = arith.constant 0 : index
    %29 = vector.load %arg7[%c0_37, %c0_38] : memref<36x80xbf16, #tpu.memory_space<vmem>>, vector<36x80xbf16>
    %cst = arith.constant dense<0.000000e+00> : vector<8x80xf32>
    %30 = tpu.matmul %28, %29, %cst {dimension_numbers = #tpu.dot_dimension_numbers<[1], [0], [0], [1], [0, 0, 1, 1], [], []>} : vector<8x36xbf16>, vector<36x80xbf16>, vector<8x80xf32> -> vector<8x80xf32>
    %31 = vector.broadcast %0 : vector<1x80xf32> to vector<8x80xf32>
    %32 = arith.mulf %30, %31 : vector<8x80xf32>
    %cst_39 = arith.constant dense<0.000000e+00> : vector<8xf32>
    %33 = vector.multi_reduction <add>, %32, %cst_39 [1] : vector<8x80xf32> to vector<8xf32>
    %34 = vector.shape_cast %33 : vector<8xf32> to vector<8x1xf32>
    %35 = arith.mulf %30, %30 : vector<8x80xf32>
    %36 = vector.broadcast %0 : vector<1x80xf32> to vector<8x80xf32>
    %37 = arith.mulf %35, %36 : vector<8x80xf32>
    %cst_40 = arith.constant dense<0.000000e+00> : vector<8xf32>
    %38 = vector.multi_reduction <add>, %37, %cst_40 [1] : vector<8x80xf32> to vector<8xf32>
    %39 = vector.shape_cast %38 : vector<8xf32> to vector<8x1xf32>
    %cst_41 = arith.constant 1.562500e-02 : f32
    %40 = vector.broadcast %cst_41 : f32 to vector<8x1xf32>
    %41 = arith.mulf %34, %40 : vector<8x1xf32>
    %cst_42 = arith.constant 1.562500e-02 : f32
    %42 = vector.broadcast %cst_42 : f32 to vector<8x1xf32>
    %43 = arith.mulf %39, %42 : vector<8x1xf32>
    %44 = arith.mulf %41, %41 : vector<8x1xf32>
    %45 = arith.subf %43, %44 : vector<8x1xf32>
    %cst_43 = arith.constant 0.000000e+00 : f32
    %46 = vector.broadcast %cst_43 : f32 to vector<8x1xf32>
    %47 = arith.maximumf %45, %46 : vector<8x1xf32>
    %48 = vector.broadcast %41 : vector<8x1xf32> to vector<8x80xf32>
    %49 = arith.subf %30, %48 : vector<8x80xf32>
    %cst_44 = arith.constant 9.99999974E-6 : f32
    %50 = vector.broadcast %cst_44 : f32 to vector<8x1xf32>
    %51 = arith.addf %47, %50 : vector<8x1xf32>
    %52 = math.rsqrt %51 : vector<8x1xf32>
    %53 = vector.broadcast %52 : vector<8x1xf32> to vector<8x80xf32>
    %54 = arith.mulf %49, %53 : vector<8x80xf32>
    %cst_45 = arith.constant 0.000000e+00 : f32
    %55 = vector.broadcast %cst_45 : f32 to vector<8x80xf32>
    %56 = arith.cmpf oge, %54, %55 : vector<8x80xf32>
    %cst_46 = arith.constant 0.00999999977 : f32
    %57 = vector.broadcast %cst_46 : f32 to vector<8x80xf32>
    %58 = arith.mulf %57, %54 : vector<8x80xf32>
    %59 = arith.select %56, %54, %58 : vector<8x80xi1>, vector<8x80xf32>
    %60 = vector.broadcast %0 : vector<1x80xf32> to vector<8x80xf32>
    %61 = arith.mulf %59, %60 : vector<8x80xf32>
    %cst_47 = arith.constant 0.000000e+00 : bf16
    %62 = vector.broadcast %cst_47 : bf16 to vector<16x11xbf16>
    %c0_48 = arith.constant 0 : index
    %c0_49 = arith.constant 0 : index
    %63 = vector.load %arg8[%c0_48, %c0_49] : memref<16x108xbf16, #tpu.memory_space<vmem>>, vector<16x11xbf16>
    tpu.vector_store %arg8[%c0_48, %c0_49], %62 {strides = array<i32>} : memref<16x108xbf16, #tpu.memory_space<vmem>>, vector<16x11xbf16>,
    %cst_50 = arith.constant 0.000000e+00 : bf16
    %64 = vector.broadcast %cst_50 : bf16 to vector<16x17xbf16>
    %c0_51 = arith.constant 0 : index
    %c91 = arith.constant 91 : index
    %65 = vector.load %arg8[%c0_51, %c91] : memref<16x108xbf16, #tpu.memory_space<vmem>>, vector<16x17xbf16>
    tpu.vector_store %arg8[%c0_51, %c91], %64 {strides = array<i32>} : memref<16x108xbf16, #tpu.memory_space<vmem>>, vector<16x17xbf16>,
    %66 = arith.truncf %61 : vector<8x80xf32> to vector<8x80xbf16>
    %c0_52 = arith.constant 0 : index
    %c11_53 = arith.constant 11 : index
    %67 = vector.load %arg8[%c0_52, %c11_53] : memref<16x108xbf16, #tpu.memory_space<vmem>>, vector<8x80xbf16>
    tpu.vector_store %arg8[%c0_52, %c11_53], %66 {strides = array<i32>} : memref<16x108xbf16, #tpu.memory_space<vmem>>, vector<8x80xbf16>,
    %c0_54 = arith.constant 0 : index
    %c0_55 = arith.constant 0 : index
    %c0_56 = arith.constant 0 : index
    %68 = vector.load %arg2[%c0_54, %c0_55, %c0_56] : memref<1x8x80xbf16, #tpu.memory_space<vmem>>, vector<1x8x80xbf16>
    %69 = vector.shape_cast %68 : vector<1x8x80xbf16> to vector<8x80xbf16>
    %c8_57 = arith.constant 8 : index
    %c11_58 = arith.constant 11 : index
    %70 = vector.load %arg8[%c8_57, %c11_58] : memref<16x108xbf16, #tpu.memory_space<vmem>>, vector<8x80xbf16>
    tpu.vector_store %arg8[%c8_57, %c11_58], %69 {strides = array<i32>} : memref<16x108xbf16, #tpu.memory_space<vmem>>, vector<8x80xbf16>,
    %c0_59 = arith.constant 0 : index
    %c0_60 = arith.constant 0 : index
    %71 = vector.load %arg8[%c0_59, %c0_60] : memref<16x108xbf16, #tpu.memory_space<vmem>>, vector<16x80xbf16>
    %c0_61 = arith.constant 0 : index
    %c0_62 = arith.constant 0 : index
    %72 = vector.load %arg9[%c0_61, %c0_62] : memref<144x80xbf16, #tpu.memory_space<vmem>>, vector<16x80xbf16>
    tpu.vector_store %arg9[%c0_61, %c0_62], %71 {strides = array<i32>} : memref<144x80xbf16, #tpu.memory_space<vmem>>, vector<16x80xbf16>,
    %c0_63 = arith.constant 0 : index
    %c1_64 = arith.constant 1 : index
    %73 = vector.load %arg8[%c0_63, %c1_64] : memref<16x108xbf16, #tpu.memory_space<vmem>>, vector<16x80xbf16>
    %c16_65 = arith.constant 16 : index
    %c0_66 = arith.constant 0 : index
    %74 = vector.load %arg9[%c16_65, %c0_66] : memref<144x80xbf16, #tpu.memory_space<vmem>>, vector<16x80xbf16>
    tpu.vector_store %arg9[%c16_65, %c0_66], %73 {strides = array<i32>} : memref<144x80xbf16, #tpu.memory_space<vmem>>, vector<16x80xbf16>,
    %c0_67 = arith.constant 0 : index
    %c2 = arith.constant 2 : index
    %75 = vector.load %arg8[%c0_67, %c2] : memref<16x108xbf16, #tpu.memory_space<vmem>>, vector<16x80xbf16>
    %c32_68 = arith.constant 32 : index
    %c0_69 = arith.constant 0 : index
    %76 = vector.load %arg9[%c32_68, %c0_69] : memref<144x80xbf16, #tpu.memory_space<vmem>>, vector<16x80xbf16>
    tpu.vector_store %arg9[%c32_68, %c0_69], %75 {strides = array<i32>} : memref<144x80xbf16, #tpu.memory_space<vmem>>, vector<16x80xbf16>,
    %c0_70 = arith.constant 0 : index
    %c10_71 = arith.constant 10 : index
    %77 = vector.load %arg8[%c0_70, %c10_71] : memref<16x108xbf16, #tpu.memory_space<vmem>>, vector<16x80xbf16>
    %c48 = arith.constant 48 : index
    %c0_72 = arith.constant 0 : index
    %78 = vector.load %arg9[%c48, %c0_72] : memref<144x80xbf16, #tpu.memory_space<vmem>>, vector<16x80xbf16>
    tpu.vector_store %arg9[%c48, %c0_72], %77 {strides = array<i32>} : memref<144x80xbf16, #tpu.memory_space<vmem>>, vector<16x80xbf16>,
    %c0_73 = arith.constant 0 : index
    %c11_74 = arith.constant 11 : index
    %79 = vector.load %arg8[%c0_73, %c11_74] : memref<16x108xbf16, #tpu.memory_space<vmem>>, vector<16x80xbf16>
    %c64 = arith.constant 64 : index
    %c0_75 = arith.constant 0 : index
    %80 = vector.load %arg9[%c64, %c0_75] : memref<144x80xbf16, #tpu.memory_space<vmem>>, vector<16x80xbf16>
    tpu.vector_store %arg9[%c64, %c0_75], %79 {strides = array<i32>} : memref<144x80xbf16, #tpu.memory_space<vmem>>, vector<16x80xbf16>,
    %c0_76 = arith.constant 0 : index
    %c12_77 = arith.constant 12 : index
    %81 = vector.load %arg8[%c0_76, %c12_77] : memref<16x108xbf16, #tpu.memory_space<vmem>>, vector<16x80xbf16>
    %c80 = arith.constant 80 : index
    %c0_78 = arith.constant 0 : index
    %82 = vector.load %arg9[%c80, %c0_78] : memref<144x80xbf16, #tpu.memory_space<vmem>>, vector<16x80xbf16>
    tpu.vector_store %arg9[%c80, %c0_78], %81 {strides = array<i32>} : memref<144x80xbf16, #tpu.memory_space<vmem>>, vector<16x80xbf16>,
    %c0_79 = arith.constant 0 : index
    %c20_80 = arith.constant 20 : index
    %83 = vector.load %arg8[%c0_79, %c20_80] : memref<16x108xbf16, #tpu.memory_space<vmem>>, vector<16x80xbf16>
    %c96 = arith.constant 96 : index
    %c0_81 = arith.constant 0 : index
    %84 = vector.load %arg9[%c96, %c0_81] : memref<144x80xbf16, #tpu.memory_space<vmem>>, vector<16x80xbf16>
    tpu.vector_store %arg9[%c96, %c0_81], %83 {strides = array<i32>} : memref<144x80xbf16, #tpu.memory_space<vmem>>, vector<16x80xbf16>,
    %c0_82 = arith.constant 0 : index
    %c21 = arith.constant 21 : index
    %85 = vector.load %arg8[%c0_82, %c21] : memref<16x108xbf16, #tpu.memory_space<vmem>>, vector<16x80xbf16>
    %c112 = arith.constant 112 : index
    %c0_83 = arith.constant 0 : index
    %86 = vector.load %arg9[%c112, %c0_83] : memref<144x80xbf16, #tpu.memory_space<vmem>>, vector<16x80xbf16>
    tpu.vector_store %arg9[%c112, %c0_83], %85 {strides = array<i32>} : memref<144x80xbf16, #tpu.memory_space<vmem>>, vector<16x80xbf16>,
    %c0_84 = arith.constant 0 : index
    %c22 = arith.constant 22 : index
    %87 = vector.load %arg8[%c0_84, %c22] : memref<16x108xbf16, #tpu.memory_space<vmem>>, vector<16x80xbf16>
    %c128 = arith.constant 128 : index
    %c0_85 = arith.constant 0 : index
    %88 = vector.load %arg9[%c128, %c0_85] : memref<144x80xbf16, #tpu.memory_space<vmem>>, vector<16x80xbf16>
    tpu.vector_store %arg9[%c128, %c0_85], %87 {strides = array<i32>} : memref<144x80xbf16, #tpu.memory_space<vmem>>, vector<16x80xbf16>,
    %c0_86 = arith.constant 0 : index
    %c0_87 = arith.constant 0 : index
    %89 = vector.load %arg5[%c0_86, %c0_87] : memref<16x144xbf16, #tpu.memory_space<vmem>>, vector<16x144xbf16>
    %c0_88 = arith.constant 0 : index
    %c0_89 = arith.constant 0 : index
    %90 = vector.load %arg9[%c0_88, %c0_89] : memref<144x80xbf16, #tpu.memory_space<vmem>>, vector<144x80xbf16>
    %cst_90 = arith.constant dense<0.000000e+00> : vector<16x80xf32>
    %91 = tpu.matmul %89, %90, %cst_90 {dimension_numbers = #tpu.dot_dimension_numbers<[1], [0], [0], [1], [0, 0, 1, 1], [], []>} : vector<16x144xbf16>, vector<144x80xbf16>, vector<16x80xf32> -> vector<16x80xf32>
    %92 = vector.broadcast %0 : vector<1x80xf32> to vector<16x80xf32>
    %93 = arith.mulf %91, %92 : vector<16x80xf32>
    %cst_91 = arith.constant dense<0.000000e+00> : vector<16xf32>
    %94 = vector.multi_reduction <add>, %93, %cst_91 [1] : vector<16x80xf32> to vector<16xf32>
    %95 = vector.shape_cast %94 : vector<16xf32> to vector<16x1xf32>
    %96 = arith.mulf %91, %91 : vector<16x80xf32>
    %97 = vector.broadcast %0 : vector<1x80xf32> to vector<16x80xf32>
    %98 = arith.mulf %96, %97 : vector<16x80xf32>
    %cst_92 = arith.constant dense<0.000000e+00> : vector<16xf32>
    %99 = vector.multi_reduction <add>, %98, %cst_92 [1] : vector<16x80xf32> to vector<16xf32>
    %100 = vector.shape_cast %99 : vector<16xf32> to vector<16x1xf32>
    %cst_93 = arith.constant 1.562500e-02 : f32
    %101 = vector.broadcast %cst_93 : f32 to vector<16x1xf32>
    %102 = arith.mulf %95, %101 : vector<16x1xf32>
    %cst_94 = arith.constant 1.562500e-02 : f32
    %103 = vector.broadcast %cst_94 : f32 to vector<16x1xf32>
    %104 = arith.mulf %100, %103 : vector<16x1xf32>
    %105 = arith.mulf %102, %102 : vector<16x1xf32>
    %106 = arith.subf %104, %105 : vector<16x1xf32>
    %cst_95 = arith.constant 0.000000e+00 : f32
    %107 = vector.broadcast %cst_95 : f32 to vector<16x1xf32>
    %108 = arith.maximumf %106, %107 : vector<16x1xf32>
    %109 = vector.broadcast %102 : vector<16x1xf32> to vector<16x80xf32>
    %110 = arith.subf %91, %109 : vector<16x80xf32>
    %cst_96 = arith.constant 9.99999974E-6 : f32
    %111 = vector.broadcast %cst_96 : f32 to vector<16x1xf32>
    %112 = arith.addf %108, %111 : vector<16x1xf32>
    %113 = math.rsqrt %112 : vector<16x1xf32>
    %114 = vector.broadcast %113 : vector<16x1xf32> to vector<16x80xf32>
    %115 = arith.mulf %110, %114 : vector<16x80xf32>
    %cst_97 = arith.constant 0.000000e+00 : f32
    %116 = vector.broadcast %cst_97 : f32 to vector<16x80xf32>
    %117 = arith.cmpf oge, %115, %116 : vector<16x80xf32>
    %cst_98 = arith.constant 0.00999999977 : f32
    %118 = vector.broadcast %cst_98 : f32 to vector<16x80xf32>
    %119 = arith.mulf %118, %115 : vector<16x80xf32>
    %120 = arith.select %117, %115, %119 : vector<16x80xi1>, vector<16x80xf32>
    %c0_99 = arith.constant 0 : index
    %c0_100 = arith.constant 0 : index
    %c0_101 = arith.constant 0 : index
    %121 = vector.load %arg6[%c0_99, %c0_100, %c0_101] : memref<1x16x80xf32, #tpu.memory_space<vmem>>, vector<1x16x80xf32>
    %122 = vector.shape_cast %121 : vector<1x16x80xf32> to vector<16x80xf32>
    %123 = vector.shape_cast %120 : vector<16x80xf32> to vector<1x16x80xf32>
    tpu.vector_store %arg6[%c0_99, %c0_100, %c0_101], %123 {strides = array<i32>} : memref<1x16x80xf32, #tpu.memory_space<vmem>>, vector<1x16x80xf32>,
    return
  }
  func.func @transform_0(%arg0: i32) -> (i32, i32, i32) {
    %c0_i32 = arith.constant 0 : i32
    %c0_i32_0 = arith.constant 0 : i32
    %c0_i32_1 = arith.constant 0 : i32
    return %arg0, %c0_i32, %c0_i32_0 : i32, i32, i32
  }
  func.func @transform_1(%arg0: i32) -> (i32, i32, i32) {
    %c0_i32 = arith.constant 0 : i32
    %c0_i32_0 = arith.constant 0 : i32
    %c0_i32_1 = arith.constant 0 : i32
    return %arg0, %c0_i32, %c0_i32_0 : i32, i32, i32
  }
  func.func @transform_2(%arg0: i32) -> (i32, i32) {
    %c0_i32 = arith.constant 0 : i32
    %c0_i32_0 = arith.constant 0 : i32
    %c0_i32_1 = arith.constant 0 : i32
    return %c0_i32, %c0_i32_0 : i32, i32
  }
  func.func @transform_3(%arg0: i32) -> (i32, i32) {
    %c0_i32 = arith.constant 0 : i32
    %c0_i32_0 = arith.constant 0 : i32
    %c0_i32_1 = arith.constant 0 : i32
    return %c0_i32, %c0_i32_0 : i32, i32
  }
  func.func @transform_4(%arg0: i32) -> (i32, i32) {
    %c0_i32 = arith.constant 0 : i32
    %c0_i32_0 = arith.constant 0 : i32
    %c0_i32_1 = arith.constant 0 : i32
    return %c0_i32, %c0_i32_0 : i32, i32
  }
  func.func @transform_5(%arg0: i32) -> (i32, i32, i32) {
    %c0_i32 = arith.constant 0 : i32
    %c0_i32_0 = arith.constant 0 : i32
    %c0_i32_1 = arith.constant 0 : i32
    return %arg0, %c0_i32, %c0_i32_0 : i32, i32, i32
  }
}

</mosaic_0001>

<bundles_post_ra>
// kernel: conv2x_in_forward.1
= control target key start
LH: loop header
LB: loop body
LE: loop exit
PB: predicated region body
PF: predicated region fallthrough
CT: control target
= control target key end

     0   :  { %s888_s18 = smov 0   ;;  %s986_s0 = inlined_call_operand.vmem [shape: bf16[2,16,100], index: 0, kind: input, shape index: {}]   ;;  %s987_s1 = inlined_call_operand.vmem [shape: bf16[2,8,80], index: 1, kind: input, shape index: {}]   ;;  %s988_s2 = inlined_call_operand.vmem [shape: f32[1,80], index: 2, kind: input, shape index: {}]   ;;  %s989_s3 = inlined_call_operand.vmem [shape: bf16[8,36], index: 3, kind: input, shape index: {}]   ;;  %s990_s4 = inlined_call_operand.vmem [shape: bf16[16,144], index: 4, kind: input, shape index: {}]   ;;  %s991_s5 = inlined_call_operand.vmem [shape: f32[2,16,80], index: 5, kind: output, shape index: {}]  }
   0x1 LB: > { %s733_s19 = sadd.s32 4294967295, %s846_s18   ;;  %p737_p0 = scmp.ge.s32.totalorder %s846_s18, 1  ;;  %s846_s18 = sphi %s888_s18, %s15_s18  }
   0x2   : > { %p196_p1 = scmp.lt.s32.totalorder %s846_s18, 3 }
   0x4   : > { %p197_p2 = pnand %p737_p0, %p196_p1 }
   0x5   : > { %p228_p3 = scmp.lt.s32.totalorder (!%p197_p2), %s733_s19, 1  ;;  %s848_s24 = smov (!%p197_p2), 117  }
   0x6   : > { %200 = sbr.rel (%p197_p2) target bundleno = 1045 (0x415), region = 40  ;;  %s849_s25 = smov (!%p197_p2), 118  }
   0x7   : > { %s850_s26 = smov (!%p197_p2), 127   ;;  %s852_s7 = smov (!%p197_p2), 11  }
   0x8   : > { %s853_s11 = smov (!%p197_p2), 107   ;;  %s854_s12 = smov (!%p197_p2), 108  }
   0x9   : > { %s855_s13 = smov (!%p197_p2), 116   ;;  %s856_s14 = smov (!%p197_p2), 126  }
   0xa   : > { %s857_s15 = smov (!%p197_p2), 106  }
   0xb   : > { %s993_s19 = smov (!%p228_p3, %s733_s19), 1  ;;  %vm245_vm0 = vcmask 648192   ;;  %vm248_vm1 = vcmask 650242   ;;  %vm317_vm2 = vcmask 1041408   ;;  %v292_v23 = vld [vmem:[%s989_s3] sm:$0xf] }
   0xc   : > { %s800_s20 = sshll.u32 %s993_s19, 3  ;;  %vm313_vm3 = vcmask 293888   ;;  %v922_v24 = vld [vmem:[%s988_s2] ss:$0 sm:$0xff]  ;;  %vm338_vm4 = vcmask 654336   ;;  %vm369_vm5 = vcmask 84992  }
   0xd   : > { %s232_s23 = scalar_lea.vmem %s986_s0, %s800_s20  ;;  %vm372_vm6 = vcmask 880344   ;;  %v851_v40 = vmov 0   ;;  %s740_s6 = sshll.u32 %s993_s19, 2  ;;  %vm380_vm11 = vcmask 740440   ;;  %vm390_vm12 = vcmask 650240  }
   0xe   : > { %v286_v0 = vld [vmem:[%s232_s23] sm:$0x3]  ;;  %v267_v3 = vld [vmem:[%s232_s23 + $0x4] sm:$0x3]  ;;  %v280_v5 = vld [vmem:[%s232_s23] sm:$0xc]  ;;  %s236_s10 = scalar_lea.vmem %s987_s1, %s740_s6 }
   0xf   : > { %v274_v1 = vld [vmem:[%s232_s23] sm:$0x3]  ;;  %288 = vrot.lane.b32.xlu0 %v286_v0, %s848_s24  ;;  %v269_v4 = vrot.slane %v267_v3, 6  ;;  %v261_v7 = vld [vmem:[%s232_s23 + $0x4] sm:$0xc]  ;;  %vm572_vm13 = vcmask 130048  }
  0x10   : > { %276 = vrot.lane.b32.xlu1 %v274_v1, %s849_s25  ;;  %v250_v2 = vld [vmem:[%s232_s23] sm:$0x3]  ;;  %v743_v8 = vrot.slane %v261_v7, 10  ;;  %v247_v9 = vld [vmem:[%s232_s23] sm:$0xc] }
  0x11   : > { %252 = vrot.lane.b32.xlu2 %v250_v2, %s850_s26  ;;  %v244_v6 = vld [vmem:[%s232_s23] sm:$0x3]  ;;  %v256_v10 = vld [vmem:[%s232_s23 + $0x4] sm:$0x3]  ;;  %249 = vst.msk [vmem:[#allocation2] sm:$0xc] %vm248_vm1, %v247_v9 }
  0x12   : > { %246 = vst.msk [vmem:[#allocation2] sm:$0x3] %vm245_vm0, %v244_v6  ;;  %v258_v11 = vrot.slane %v256_v10, 6  ;;  %v382_v54 = vld [vmem:[%s236_s10] sm:$0xf] }
  0x13   : > { %266 = vst.msk [vmem:[#allocation2 + $0x8] sm:$0x3] %vm245_vm0, %v743_v8 }
  0x14   : > { %260 = vst.msk [vmem:[#allocation2 + $0x4] sm:$0xc] %vm248_vm1, %v258_v11 }
  0x15   : > { %370 = vst.msk [vmem:[#allocation3] sm:$0xf] %vm369_vm5, %v851_v40 }
  0x16   : > { %373 = vst.msk [vmem:[#allocation3] sm:$0xf] %vm372_vm6, %v851_v40 }
  0x17   : > { %270 = vrot.lane.b32.xlu0 %v269_v4, %s850_s26  ;;  %371 = vst.msk [vmem:[#allocation3 + $0x4] sm:$0xf] %vm369_vm5, %v851_v40 }
  0x18   : > { %282 = vrot.lane.b32.xlu1 %v280_v5, %s849_s25  ;;  %374 = vst.msk [vmem:[#allocation3 + $0x4] sm:$0xf] %vm372_vm6, %v851_v40 }
  0x6b   : > { %v253_v12 = vpop.permute.xlu2 %252 }
  0x6c   : > { %255 = vst.msk [vmem:[#allocation2 + $0x4] sm:$0x3] %vm245_vm0, %v253_v12 }
  0x73   : > { %v802_v22 = vld [vmem:[#allocation2] sm:$0xff] }
  0x81   : > { %v289_v13 = vpop.permute.xlu0 %288 }
  0x82   : > { %v277_v14 = vpop.permute.xlu1 %276  ;;  %291 = vst.msk [vmem:[#allocation2 + $0x10] sm:$0x3] %vm245_vm0, %v289_v13 }
  0x83   : > { %279 = vst.msk [vmem:[#allocation2 + $0xc] sm:$0x3] %vm245_vm0, %v277_v14 }
  0x89   : > { %v271_v16 = vpop.permute.xlu0 %270  ;;  %v297_v17 = vld [vmem:[#allocation2 + $0x10] sm:$0x3] }
  0x8a   : > { %v283_v15 = vpop.permute.xlu1 %282  ;;  %v307_v18 = vunpack.c.l.b16 %v297_v17  ;;  %273 = vst.msk [vmem:[#allocation2 + $0x8] sm:$0xc] %vm248_vm1, %v271_v16 }
  0x8b   : > { %285 = vst.msk [vmem:[#allocation2 + $0xc] sm:$0xc] %vm248_vm1, %v283_v15 }
  0x8c   : > { %v310_v19 = vpack.c.b16 %v307_v18, %v307_v18 }
  0x8e   : > { %v319_v20 = vsel %vm317_vm2, %v310_v19, 0 }
  0x8f   : > { %326 = vmatpush.bf16.msra.mxu0 %v319_v20 }
  0x92   : > { %v803_v21 = vld [vmem:[#allocation2 + $0x8] sm:$0xff] }
  0x93   : > { %327 = vmatpush.bf16.msra.mxu0 %v803_v21 }
  0x97   : > { %328 = vmatpush.bf16.msra.mxu0 %v802_v22 }
  0x9a   : > { %752 = vmatmul.msk.bf16.vlgmr.msra.gmra.mxu0 %vm313_vm3, %v292_v23 }
 0x117   : > { %v330_v25 = vpop.f32.mrf.mxu0 }
 0x118   : > { %v342_v26 = vmul.f32 %v330_v25, %v330_v25  ;;  %v337_v27 = vmul.f32 %v922_v24, %v330_v25 }
 0x11a   : > { %v339_v28 = vsel %vm338_vm4, %v337_v27, 0.0  ;;  %v343_v29 = vmul.f32 %v922_v24, %v342_v26 }
 0x11b   : > { %340 = vadd.xlane.f32.xlu2 %v339_v28 }
 0x11c   : > { %v344_v30 = vsel %vm338_vm4, %v343_v29, 0.0 }
 0x11d   : > { %345 = vadd.xlane.f32.xlu0 %v344_v30 }
 0x11f   : > { %v332_v31 = vpop.f32.mrf.mxu0 }
 0x18e   : > { %v341_v32 = vpop.xlane.xlu2 %340 }
 0x18f   : > { %v347_v33 = vmul.f32 0.015625, %v341_v32 }
 0x190   : > { %v346_v34 = vpop.xlane.xlu0 %345 }
 0x191   : > { %v349_v35 = vmul.f32 %v347_v33, %v347_v33  ;;  %v348_v36 = vmul.f32 0.015625, %v346_v34  ;;  %v352_v47 = vsub.f32 %v330_v25, %v347_v33 }
 0x193   : > { %v350_v37 = vsub.f32 %v348_v36, %v349_v35  ;;  %v755_v35 = vld [vmem:[%s990_s4] sm:$0xf]  ;;  %v805_v36 = vld [vmem:[%s990_s4 + $0x4] sm:$0xf0] }
 0x195   : > { %v351_v38 = vmax.f32 %v350_v37, 0.0  ;;  %v804_v37 = vld [vmem:[%s990_s4 + $0x4] sm:$0xf] }
 0x197   : > { %v353_v39 = vadd.f32 1e-05, %v351_v38  ;;  %v757_v38 = vld [vmem:[%s990_s4 + $0x8] sm:$0xf0] }
 0x199   : > { %834 = vrsqrt.f32 %v353_v39  ;;  %vm360_vm8 = vweird.f32 %v353_v39 }
 0x19f   : > { %v835_v41 = vpop.eup %834 }
 0x1a0   : > { %v355_v42 = vmul.f32 %v835_v41, %v353_v39  ;;  %vm361_vm7 = vweird.f32 %v835_v41 }
 0x1a1   : > { %vm362_vm9 = vmor %vm360_vm8, %vm361_vm7 }
 0x1a2   : > { %v356_v43 = vmul.f32 %v835_v41, %v355_v42  ;;  %v760_v42 = vor.u32 %v804_v37, %v757_v38 }
 0x1a4   : > { %v357_v44 = vmul.f32 0.5, %v356_v43 }
 0x1a6   : > { %v358_v45 = vsub.f32 1.5, %v357_v44 }
 0x1a8   : > { %v359_v46 = vmul.f32 %v835_v41, %v358_v45 }
 0x1aa   : > { %v363_v48 = vsel %vm362_vm9, %v835_v41, %v359_v46  ;;  %v756_v41 = vor.u32 %v805_v36, %v755_v35 }
 0x1ab   : > { %v364_v49 = vmul.f32 %v363_v48, %v352_v47 }
 0x1ad   : > { %vm365_vm10 = vcmp.ge.f32.partialorder %v364_v49, 0.0  ;;  %v366_v50 = vmul.f32 0.01, %v364_v49 }
 0x1af   : > { %v367_v51 = vsel %vm365_vm10, %v364_v49, %v366_v50 }
 0x1b0   : > { %v368_v52 = vmul.f32 %v922_v24, %v367_v51 }
 0x1b2   : > { %v375_v53 = vpack.c.bf16 %v368_v52, %v368_v52 }
 0x1b4   : > { %377 = vrot.lane.b32.xlu1 %v375_v53, %s852_s7 }
 0x1bc   : > { %384 = vrot.lane.b32.xlu1 %v382_v54, %s852_s7 }
 0x226   : > { %v378_v55 = vpop.permute.xlu1 %377 }
 0x227   : > { %381 = vst.msk [vmem:[#allocation3] sm:$0xf] %vm380_vm11, %v378_v55 }
 0x22e   : > { %v388_v56 = vld [vmem:[#allocation3] sm:$0xf]  ;;  %v385_v57 = vpop.permute.xlu1 %384 }
 0x22f   : > { %387 = vst.msk [vmem:[#allocation3 + $0x4] sm:$0xf] %vm380_vm11, %v385_v57  ;;  %v465_v1 = vld [vmem:[#allocation3] sm:$0xf] }
 0x230   : > { %391 = vst.msk [vmem:[#allocation4] sm:$0xf] %vm390_vm12, %v388_v56  ;;  %v417_v2 = vld [vmem:[#allocation3] sm:$0xf] }
 0x231   : > { %v477_v3 = vld [vmem:[#allocation3] sm:$0xf] }
 0x232   : > { %v453_v4 = vld [vmem:[#allocation3] sm:$0xf] }
 0x233   : > { %v393_v5 = vld [vmem:[#allocation3] sm:$0xf] }
 0x234   : > { %v441_v7 = vld [vmem:[#allocation3] sm:$0xf] }
 0x235   : > { %v429_v8 = vld [vmem:[#allocation3] sm:$0xf] }
 0x236   : > { %v389_v58 = vld [vmem:[#allocation3 + $0x4] sm:$0xf]  ;;  %v405_v9 = vld [vmem:[#allocation3] sm:$0xf] }
 0x237   : > { %v466_v59 = vld [vmem:[#allocation3 + $0x4] sm:$0xf]  ;;  %392 = vst.msk [vmem:[#allocation4 + $0x4] sm:$0xf] %vm390_vm12, %v389_v58 }
 0x238   : > { %v454_v60 = vld [vmem:[#allocation3 + $0x4] sm:$0xf]  ;;  %471 = vrot.lane.b32.xlu1 %v466_v59, %s853_s11 }
 0x239   : > { %459 = vrot.lane.b32.xlu2 %v454_v60, %s854_s12  ;;  %v442_v61 = vld [vmem:[#allocation3 + $0x4] sm:$0xf] }
 0x23a   : > { %447 = vrot.lane.b32.xlu0 %v442_v61, %s855_s13  ;;  %v430_v62 = vld [vmem:[#allocation3 + $0x4] sm:$0xf] }
 0x23b   : > { %v406_v63 = vld [vmem:[#allocation3 + $0x4] sm:$0xf] }
 0x23c   : > { %v418_v0 = vld [vmem:[#allocation3 + $0x4] sm:$0xf] }
 0x23d   : > { %v394_v6 = vld [vmem:[#allocation3 + $0x4] sm:$0xf] }
 0x23e   : > { %v478_v10 = vld [vmem:[#allocation3 + $0x4] sm:$0xf]  ;;  %v806_v39 = vld [vmem:[#allocation4] sm:$0xff] }
 0x240   : > { %435 = vrot.lane.b32.xlu1 %v430_v62, %s848_s24 }
 0x241   : > { %411 = vrot.lane.b32.xlu2 %v406_v63, %s856_s14 }
 0x242   : > { %423 = vrot.lane.b32.xlu0 %v418_v0, %s849_s25 }
 0x248   : > { %469 = vrot.lane.b32.xlu1 %v465_v1, %s853_s11 }
 0x249   : > { %421 = vrot.lane.b32.xlu2 %v417_v2, %s849_s25 }
 0x24a   : > { %481 = vrot.lane.b32.xlu0 %v477_v3, %s857_s15 }
 0x250   : > { %457 = vrot.lane.b32.xlu1 %v453_v4, %s854_s12 }
 0x251   : > { %397 = vrot.lane.b32.xlu2 %v393_v5, %s850_s26 }
 0x252   : > { %399 = vrot.lane.b32.xlu0 %v394_v6, %s850_s26  ;;  %s801_s26 = sshll.u32 %s993_s19, 4 }
 0x253   : > { %s241_s29 = scalar_lea.vmem %s991_s5, %s801_s26 }
 0x258   : > { %445 = vrot.lane.b32.xlu1 %v441_v7, %s855_s13 }
 0x260   : > { %433 = vrot.lane.b32.xlu1 %v429_v8, %s848_s24 }
 0x268   : > { %409 = vrot.lane.b32.xlu1 %v405_v9, %s856_s14 }
 0x270   : > { %483 = vrot.lane.b32.xlu1 %v478_v10, %s857_s15 }
 0x293   : > { %v460_v11 = vpop.permute.xlu2 %459 }
 0x294   : > { %464 = vst.msk [vmem:[#allocation4 + $0x34] sm:$0xf] %vm390_vm12, %v460_v11 }
 0x29b   : > { %v412_v12 = vpop.permute.xlu2 %411 }
 0x29c   : > { %416 = vst.msk [vmem:[#allocation4 + $0x14] sm:$0xf] %vm390_vm12, %v412_v12 }
 0x2a3   : > { %v422_v13 = vpop.permute.xlu2 %421 }
 0x2a4   : > { %427 = vst.msk [vmem:[#allocation4 + $0x18] sm:$0xf] %vm390_vm12, %v422_v13 }
 0x2aa   : > { %v472_v14 = vpop.permute.xlu1 %471 }
 0x2ab   : > { %v398_v15 = vpop.permute.xlu2 %397  ;;  %476 = vst.msk [vmem:[#allocation4 + $0x3c] sm:$0xf] %vm390_vm12, %v472_v14 }
 0x2ac   : > { %v448_v16 = vpop.permute.xlu0 %447  ;;  %403 = vst.msk [vmem:[#allocation4 + $0x8] sm:$0xf] %vm390_vm12, %v398_v15 }
 0x2ad   : > { %452 = vst.msk [vmem:[#allocation4 + $0x2c] sm:$0xf] %vm390_vm12, %v448_v16 }
 0x2b2   : > { %v436_v17 = vpop.permute.xlu1 %435 }
 0x2b3   : > { %440 = vst.msk [vmem:[#allocation4 + $0x24] sm:$0xf] %vm390_vm12, %v436_v17 }
 0x2b4   : > { %v424_v18 = vpop.permute.xlu0 %423 }
 0x2b5   : > { %428 = vst.msk [vmem:[#allocation4 + $0x1c] sm:$0xf] %vm390_vm12, %v424_v18 }
 0x2ba   : > { %v470_v19 = vpop.permute.xlu1 %469 }
 0x2bb   : > { %475 = vst.msk [vmem:[#allocation4 + $0x38] sm:$0xf] %vm390_vm12, %v470_v19 }
 0x2bc   : > { %v482_v20 = vpop.permute.xlu0 %481  ;;  %v809_v31 = vld [vmem:[#allocation4 + $0x18] sm:$0xff] }
 0x2bd   : > { %487 = vst.msk [vmem:[#allocation4 + $0x40] sm:$0xf] %vm390_vm12, %v482_v20 }
 0x2c2   : > { %v458_v21 = vpop.permute.xlu1 %457  ;;  %v813_v22 = vld [vmem:[#allocation4 + $0x38] sm:$0xff] }
 0x2c3   : > { %463 = vst.msk [vmem:[#allocation4 + $0x30] sm:$0xf] %vm390_vm12, %v458_v21  ;;  %576 = vmatpush.bf16.msra.mxu1 %v813_v22 }
 0x2c4   : > { %v400_v23 = vpop.permute.xlu0 %399 }
 0x2c5   : > { %404 = vst.msk [vmem:[#allocation4 + $0xc] sm:$0xf] %vm390_vm12, %v400_v23 }
 0x2ca   : > { %v446_v25 = vpop.permute.xlu1 %445  ;;  %v812_v26 = vld [vmem:[#allocation4 + $0x30] sm:$0xff] }
 0x2cb   : > { %451 = vst.msk [vmem:[#allocation4 + $0x28] sm:$0xf] %vm390_vm12, %v446_v25  ;;  %577 = vmatpush.bf16.msra.mxu1 %v812_v26 }
 0x2cc   : > { %v807_v34 = vld [vmem:[#allocation4 + $0x8] sm:$0xff] }
 0x2d2   : > { %v434_v27 = vpop.permute.xlu1 %433  ;;  %v811_v28 = vld [vmem:[#allocation4 + $0x28] sm:$0xff] }
 0x2d3   : > { %439 = vst.msk [vmem:[#allocation4 + $0x20] sm:$0xf] %vm390_vm12, %v434_v27  ;;  %578 = vmatpush.bf16.msra.mxu1 %v811_v28 }
 0x2da   : > { %v410_v29 = vpop.permute.xlu1 %409  ;;  %v810_v30 = vld [vmem:[#allocation4 + $0x20] sm:$0xff] }
 0x2db   : > { %415 = vst.msk [vmem:[#allocation4 + $0x10] sm:$0xf] %vm390_vm12, %v410_v29  ;;  %579 = vmatpush.bf16.msra.mxu1 %v810_v30 }
 0x2df   : > { %580 = vmatpush.bf16.msra.mxu1 %v809_v31 }
 0x2e2   : > { %v484_v32 = vpop.permute.xlu1 %483  ;;  %v808_v33 = vld [vmem:[#allocation4 + $0x10] sm:$0xff] }
 0x2e3   : > { %488 = vst.msk [vmem:[#allocation4 + $0x44] sm:$0xf] %vm390_vm12, %v484_v32  ;;  %581 = vmatpush.bf16.msra.mxu1 %v808_v33 }
 0x2e7   : > { %582 = vmatpush.bf16.msra.mxu1 %v807_v34 }
 0x2ea   : > { %v814_v40 = vld [vmem:[#allocation4 + $0x40] sm:$0xff] }
 0x2eb   : > { %583 = vmatpush.bf16.msra.mxu1 %v806_v39  ;;  %597 = vmatpush.bf16.msra.mxu2 %v814_v40 }
 0x2ee   : > { %584 = vmatmul.bf16.vlgmr.msra.gmra.mxu1 %v756_v41  ;;  %797 = vmatmul.msk.bf16.vlgmr.msra.gmra.mxu2 %vm572_vm13, %v760_v42 }
 0x36b   : > { %v585_v43 = vpop.f32.mrf.mxu1 }
 0x371   : > { %v599_v44 = vpop.f32.mrf.mxu2 }
 0x372   : > { %v600_v45 = vadd.f32 %v599_v44, %v585_v43 }
 0x373   : > { %v587_v51 = vpop.f32.mrf.mxu1 }
 0x374   : > { %v604_v46 = vmul.f32 %v922_v24, %v600_v45  ;;  %v612_v47 = vmul.f32 %v600_v45, %v600_v45 }
 0x376   : > { %v606_v48 = vsel %vm338_vm4, %v604_v46, 0.0  ;;  %v614_v49 = vmul.f32 %v922_v24, %v612_v47 }
 0x377   : > { %607 = vadd.xlane.f32.xlu1 %v606_v48 }
 0x378   : > { %v616_v50 = vsel %vm338_vm4, %v614_v49, 0.0 }
 0x379   : > { %v601_v52 = vpop.f32.mrf.mxu2  ;;  %617 = vadd.xlane.f32.xlu0 %v616_v50 }
 0x37a   : > { %v602_v53 = vadd.f32 %v601_v52, %v587_v51 }
 0x37c   : > { %v605_v54 = vmul.f32 %v922_v24, %v602_v53  ;;  %v613_v55 = vmul.f32 %v602_v53, %v602_v53 }
 0x37e   : > { %v609_v56 = vsel %vm338_vm4, %v605_v54, 0.0  ;;  %v615_v57 = vmul.f32 %v922_v24, %v613_v55 }
 0x37f   : > { %610 = vadd.xlane.f32.xlu2 %v609_v56 }
 0x380   : > { %v619_v58 = vsel %vm338_vm4, %v615_v57, 0.0 }
 0x381   : > { %620 = vadd.xlane.f32.xlu1 %v619_v58 }
 0x3ea   : > { %v608_v59 = vpop.xlane.xlu1 %607 }
 0x3eb   : > { %v622_v60 = vmul.f32 0.015625, %v608_v59 }
 0x3ec   : > { %v618_v61 = vpop.xlane.xlu0 %617 }
 0x3ed   : > { %v626_v62 = vmul.f32 %v622_v60, %v622_v60  ;;  %v624_v63 = vmul.f32 0.015625, %v618_v61  ;;  %v632_v17 = vsub.f32 %v600_v45, %v622_v60 }
 0x3ef   : > { %v628_v0 = vsub.f32 %v624_v63, %v626_v62 }
 0x3f1   : > { %v630_v1 = vmax.f32 %v628_v0, 0.0 }
 0x3f2   : > { %v611_v2 = vpop.xlane.xlu2 %610 }
 0x3f3   : > { %v634_v3 = vadd.f32 1e-05, %v630_v1  ;;  %v623_v4 = vmul.f32 0.015625, %v611_v2 }
 0x3f4   : > { %v621_v5 = vpop.xlane.xlu1 %620 }
 0x3f5   : > { %836 = vrsqrt.f32 %v634_v3  ;;  %v627_v6 = vmul.f32 %v623_v4, %v623_v4  ;;  %v625_v7 = vmul.f32 0.015625, %v621_v5  ;;  %vm642_vm15 = vweird.f32 %v634_v3 }
 0x3f6   : > { %v633_v28 = vsub.f32 %v602_v53, %v623_v4 }
 0x3f7   : > { %v629_v8 = vsub.f32 %v625_v7, %v627_v6 }
 0x3f9   : > { %v631_v24 = vmax.f32 %v629_v8, 0.0 }
 0x3fb   : > { %v837_v9 = vpop.eup %836  ;;  %v635_v11 = vadd.f32 1e-05, %v631_v24 }
 0x3fc   : > { %v637_v10 = vmul.f32 %v837_v9, %v634_v3  ;;  %vm643_vm14 = vweird.f32 %v837_v9 }
 0x3fd   : > { %838 = vrsqrt.f32 %v635_v11  ;;  %vm644_vm0 = vmor %vm642_vm15, %vm643_vm14  ;;  %vm652_vm3 = vweird.f32 %v635_v11 }
 0x3fe   : > { %v638_v12 = vmul.f32 %v837_v9, %v637_v10 }
 0x400   : > { %v639_v13 = vmul.f32 0.5, %v638_v12 }
 0x402   : > { %v640_v14 = vsub.f32 1.5, %v639_v13 }
 0x403   : > { %v839_v15 = vpop.eup %838 }
 0x404   : > { %v641_v16 = vmul.f32 %v837_v9, %v640_v14  ;;  %v647_v18 = vmul.f32 %v839_v15, %v635_v11  ;;  %vm653_vm2 = vweird.f32 %v839_v15 }
 0x405   : > { %vm654_vm5 = vmor %vm652_vm3, %vm653_vm2 }
 0x406   : > { %v645_v19 = vsel %vm644_vm0, %v837_v9, %v641_v16  ;;  %v648_v21 = vmul.f32 %v839_v15, %v647_v18 }
 0x407   : > { %v656_v20 = vmul.f32 %v645_v19, %v632_v17 }
 0x408   : > { %v649_v23 = vmul.f32 0.5, %v648_v21 }
 0x409   : > { %vm658_vm1 = vcmp.ge.f32.partialorder %v656_v20, 0.0  ;;  %v660_v22 = vmul.f32 0.01, %v656_v20 }
 0x40a   : > { %v650_v26 = vsub.f32 1.5, %v649_v23 }
 0x40b   : > { %v662_v25 = vsel %vm658_vm1, %v656_v20, %v660_v22 }
 0x40c   : > { %664 = vst.msk [vmem:[%s241_s29] sm:$0xff] %vm338_vm4, %v662_v25  ;;  %v651_v27 = vmul.f32 %v839_v15, %v650_v26 }
 0x40e   : > { %v655_v29 = vsel %vm654_vm5, %v839_v15, %v651_v27 }
 0x40f   : > { %v657_v30 = vmul.f32 %v655_v29, %v633_v28 }
 0x411   : > { %vm659_vm6 = vcmp.ge.f32.partialorder %v657_v30, 0.0  ;;  %v661_v31 = vmul.f32 0.01, %v657_v30 }
 0x413   : > { %v663_v32 = vsel %vm659_vm6, %v657_v30, %v661_v31 }
 0x414   : > { %665 = vst.msk [vmem:[%s241_s29 + $0x8] sm:$0xff] %vm338_vm4, %v663_v32 }
 0x415 PF: > { %s15_s18 = sadd.s32 1, %s846_s18  }
 0x416   : > { %p12_p4 = scmp.ge.s32.totalorder %s15_s18, 4  }
 0x418   :  { %14 = sbr.rel (!%p12_p4) target bundleno = 1 (0x1), region = 73 }

</bundles_post_ra>
